<compile_context>
chip_gen: v6e
topology: v6e:2x2x1
jax: 0.10.0
libtpu: 0.0.40
codegen_flags: <defaults>
</compile_context>

<pallas_src>
import jax
import jax.numpy as jnp
from jax.experimental import pallas as pl
from jax.experimental.pallas import tpu as pltpu

IN_FEATURES = 768  # fixed by the module: nn.Linear(768, config.d_model)


def _round_up(x, mult):
    return ((x + mult - 1) // mult) * mult


def _cdiv(a, b):
    return -(-a // b)


def _vmem_capacity_bytes():
    """Physical VMEM per TensorCore; falls back to the v5e/v6e value (128 MiB)."""
    try:
        info = pltpu.get_tpu_info()
        for attr in ("vmem_capacity_bytes", "vmem_size_bytes", "vmem_bytes"):
            v = getattr(info, attr, None)
            if v:
                return int(v)
    except Exception:
        pass
    return 128 << 20


def _row_alignment(*dtypes):
    """Sublane alignment for the second-to-last block dim (8 f32 / 16 bf16 / 32 i8)."""
    align = 8
    for dt in dtypes:
        align = max(align, 32 // jnp.dtype(dt).itemsize)
    return align


def _pick_tile_m(m, target, row_align):
    """M tile: prefer exact divisors (no padded MXU passes); cdiv fallback."""
    if m <= target:
        return _round_up(m, row_align)   # single tile, pad only to the sublane multiple
    for align in (256, 128):             # 256 keeps v6e/v7x MXU passes full; 128 fits v5e
        if align % row_align:
            continue
        t = (target // align) * align
        while t >= align:
            if m % t == 0:
                return t
            t -= align
    return target                        # partial last tile (masked), waste < target rows


def _pick_tile_n(n_padded, target):
    """N tile: a 128-multiple divisor of the padded d_model (lane-dense, zero waste)."""
    if n_padded <= target:
        return n_padded
    t = (target // 128) * 128
    while t > 128 and n_padded % t:
        t -= 128
    return t


def _img_projector_kernel(x_ref, w_ref, b_ref, o_ref):
    # x_ref: (TM, K) caller dtype, w_ref: (K, TN) bf16, b_ref: (1, TN) f32,
    # o_ref: (TM, TN) out dtype.
    x = x_ref[...]
    if x.dtype != jnp.bfloat16:
        x = x.astype(jnp.bfloat16)                                   # VPU, pipelined
    acc = jnp.dot(x, w_ref[...], preferred_element_type=jnp.float32)  # MXU, f32 acc
    acc = acc + b_ref[...]                                            # bias over rows
    o_ref[...] = jnp.maximum(acc, 0.0).astype(o_ref.dtype)            # ReLU + cast


def img_projector(x, weight, bias, *, out_dtype=None, tile_m=None, tile_n=None):
    """ImgProjector forward: relu(x @ weight + bias).

    x: (batch, seq, 768); weight: (768, d_model) (== torch linear.weight.T);
    bias: (d_model,).
    out_dtype defaults to x.dtype (matches the PyTorch module); pass
    jnp.bfloat16 to halve output HBM stores on store-bound v6e/v7x.
    Pass bf16 activations to avoid the in-kernel cast and halve x HBM reads.
    """
    batch, seq, k = x.shape
    assert k == IN_FEATURES, f"expected {IN_FEATURES} input features, got {k}"
    n = weight.shape[1]
    assert weight.shape == (k, n) and bias.shape == (n,)
    if out_dtype is None:
        out_dtype = x.dtype
    m = batch * seq

    # ---- Per-generation budgets (v5e/v6e: 128 MiB VMEM; v7x: 64 MiB per TC).
    big_vmem = _vmem_capacity_bytes() >= (100 << 20)
    tn_target = 4096 if big_vmem else 2048
    tm_target = 1024 if (big_vmem and m >= 4096) else 512
    row_align = _row_alignment(x.dtype, out_dtype)

    # ---- N: pad only to the 128-lane multiple; tile with a divisor of n_padded.
    n_padded = _round_up(n, 128)
    if tile_n is None:
        tile_n = _pick_tile_n(n_padded, tn_target)
    assert tile_n % 128 == 0 and n_padded % tile_n == 0
    n_tiles = n_padded // tile_n

    # ---- M: no activation padding; cdiv grid with a divisor-friendly tile.
    if tile_m is None:
        tile_m = _pick_tile_m(m, tm_target, row_align)
    tile_m = max(row_align, _round_up(tile_m, row_align))
    m_tiles = _cdiv(m, tile_m)

    # Single-step problems: split M so v7x's second TensorCore gets work and the
    # input/output DMAs overlap the matmul (one extra cheap step elsewhere).
    if m_tiles == 1 and n_tiles == 1 and m >= 256:
        tile_m = _round_up(_cdiv(m, 2), row_align)
        m_tiles = _cdiv(m, tile_m)

    # ---- Operands. x: reshape is metadata-only; no extra HBM pass over it.
    x2d = x.reshape(m, k)
    w = weight.astype(jnp.bfloat16)          # params: cast once (usually already bf16)
    b = bias.astype(jnp.float32)
    if n_padded != n:
        w = jnp.pad(w, ((0, 0), (0, n_padded - n)))
        b = jnp.pad(b, ((0, n_padded - n),))
    b2d = b.reshape(1, n_padded)

    # ---- Grid order by total HBM traffic (weight-stationary vs x-stationary).
    x_itemsize = jnp.dtype(x2d.dtype).itemsize
    out_itemsize = jnp.dtype(out_dtype).itemsize
    n_outer_bytes = k * n_padded * 2 + n_tiles * m * k * x_itemsize
    m_outer_bytes = m * k * x_itemsize + m_tiles * k * n_padded * 2
    n_outer = n_outer_bytes <= m_outer_bytes
    if n_tiles == 1:
        n_outer = False        # multi-step M axis first: both v7x cores get work
    elif m_tiles == 1:
        n_outer = True

    if n_outer:
        grid = (n_tiles, m_tiles)
        x_map = lambda nj, mi: (mi, 0)
        w_map = lambda nj, mi: (0, nj)
        b_map = lambda nj, mi: (0, nj)
        o_map = lambda nj, mi: (mi, nj)
    else:
        grid = (m_tiles, n_tiles)
        x_map = lambda mi, nj: (mi, 0)
        w_map = lambda mi, nj: (0, nj)
        b_map = lambda mi, nj: (0, nj)
        o_map = lambda mi, nj: (mi, nj)

    # ---- VMEM limit: double-buffered step footprint + headroom, capped per gen.
    step_bytes = (tile_m * k * x_itemsize          # activation tile
                  + k * tile_n * 2                 # weight slice (bf16)
                  + tile_n * 4                     # bias row (f32)
                  + tile_m * tile_n * out_itemsize)
    gen_cap = (96 << 20) if big_vmem else (48 << 20)
    vmem_limit = int(min(max(2 * step_bytes + (4 << 20), 16 << 20), gen_cap))

    cost = pl.CostEstimate(
        flops=2 * m * k * n_padded,
        transcendentals=0,
        bytes_accessed=int(min(n_outer_bytes, m_outer_bytes)
                           + n_padded * 4 + m * n_padded * out_itemsize),
    )

    out2d = pl.pallas_call(
        _img_projector_kernel,
        out_shape=jax.ShapeDtypeStruct((m, n_padded), out_dtype),
        grid_spec=pltpu.PrefetchScalarGridSpec(
            num_scalar_prefetch=0,
            grid=grid,
            in_specs=[
                pl.BlockSpec((tile_m, k), x_map),       # activation tile
                pl.BlockSpec((k, tile_n), w_map),       # weight slice
                pl.BlockSpec((1, tile_n), b_map),       # bias row
            ],
            out_specs=pl.BlockSpec((tile_m, tile_n), o_map),
        ),
        compiler_params=pltpu.CompilerParams(
            dimension_semantics=("parallel", "parallel"),
            vmem_limit_bytes=vmem_limit,
        ),
        cost_estimate=cost,
    )(x2d, w, b2d)

    if n_padded != n:
        out2d = out2d[:, :n]
    return out2d.reshape(batch, seq, n)


def _reference(x, weight, bias):
    return jax.nn.relu(jnp.einsum("bsk,kn->bsn", x, weight) + bias)


if __name__ == "__main__":
    batch, seq, d_model = 2, 8, 32

    key = jax.random.PRNGKey(0)
    kx, kw, kb = jax.random.split(key, 3)

    # Deterministic synthetic parameters (shapes from nn.Linear(768, d_model)).
    x = jax.random.normal(kx, (batch, seq, IN_FEATURES), dtype=jnp.float32)
    weight = jax.random.normal(kw, (IN_FEATURES, d_model), dtype=jnp.float32) * 0.02
    bias = jax.random.normal(kb, (d_model,), dtype=jnp.float32) * 0.02

    out = img_projector(x, weight, bias)
    out = jax.block_until_ready(out)

    ref = _reference(x, weight, bias)
    assert out.shape == (batch, seq, d_model)
    assert out.dtype == x.dtype
    # bf16 MXU operands with f32 accumulation -> loose tolerance vs f32 reference.
    assert jnp.allclose(out, ref, atol=2e-2, rtol=2e-2)

    print("KERNEL_OK")
</pallas_src>

<mosaic_0001>
module attributes {stable_mosaic.version = 11 : i64} {
  func.func @_img_projector_kernel(%arg0: i32, %arg1: i32, %arg2: memref<16x768xf32, #tpu.memory_space<vmem>>, %arg3: memref<768x128xbf16, #tpu.memory_space<vmem>>, %arg4: memref<1x128xf32, #tpu.memory_space<vmem>>, %arg5: memref<16x128xf32, #tpu.memory_space<vmem>>) attributes {dimension_semantics = [#tpu.dimension_semantics<parallel>, #tpu.dimension_semantics<parallel>], iteration_bounds = array<i64: 1, 1>, scalar_prefetch = 0 : i64, scratch_operands = 0 : i64, tpu.core_type = #tpu.core_type<tc>, window_params = [{transform_indices = @transform_0, window_bounds = array<i64: 16, 768>}, {transform_indices = @transform_1, window_bounds = array<i64: 768, 128>}, {transform_indices = @transform_2, window_bounds = array<i64: 1, 128>}, {transform_indices = @transform_3, window_bounds = array<i64: 16, 128>}]} {
    %c0 = arith.constant 0 : index
    %c0_0 = arith.constant 0 : index
    %0 = vector.load %arg2[%c0, %c0_0] : memref<16x768xf32, #tpu.memory_space<vmem>>, vector<16x768xf32>
    %1 = arith.truncf %0 : vector<16x768xf32> to vector<16x768xbf16>
    %c0_1 = arith.constant 0 : index
    %c0_2 = arith.constant 0 : index
    %2 = vector.load %arg3[%c0_1, %c0_2] : memref<768x128xbf16, #tpu.memory_space<vmem>>, vector<768x128xbf16>
    %cst = arith.constant dense<0.000000e+00> : vector<16x128xf32>
    %3 = tpu.matmul %1, %2, %cst {dimension_numbers = #tpu.dot_dimension_numbers<[1], [0], [0], [1], [0, 0, 1, 1], [], []>} : vector<16x768xbf16>, vector<768x128xbf16>, vector<16x128xf32> -> vector<16x128xf32>
    %c0_3 = arith.constant 0 : index
    %c0_4 = arith.constant 0 : index
    %4 = vector.load %arg4[%c0_3, %c0_4] : memref<1x128xf32, #tpu.memory_space<vmem>>, vector<1x128xf32>
    %5 = vector.broadcast %4 : vector<1x128xf32> to vector<16x128xf32>
    %6 = arith.addf %3, %5 : vector<16x128xf32>
    %cst_5 = arith.constant 0.000000e+00 : f32
    %7 = vector.broadcast %cst_5 : f32 to vector<16x128xf32>
    %8 = arith.maximumf %6, %7 : vector<16x128xf32>
    %c0_6 = arith.constant 0 : index
    %c0_7 = arith.constant 0 : index
    %9 = vector.load %arg5[%c0_6, %c0_7] : memref<16x128xf32, #tpu.memory_space<vmem>>, vector<16x128xf32>
    tpu.vector_store %arg5[%c0_6, %c0_7], %8 {strides = array<i32>} : memref<16x128xf32, #tpu.memory_space<vmem>>, vector<16x128xf32>,
    return
  }
  func.func @transform_0(%arg0: i32, %arg1: i32) -> (i32, i32) {
    %c0_i32 = arith.constant 0 : i32
    %c0_i32_0 = arith.constant 0 : i32
    return %arg0, %c0_i32 : i32, i32
  }
  func.func @transform_1(%arg0: i32, %arg1: i32) -> (i32, i32) {
    %c0_i32 = arith.constant 0 : i32
    %c0_i32_0 = arith.constant 0 : i32
    return %c0_i32, %arg1 : i32, i32
  }
  func.func @transform_2(%arg0: i32, %arg1: i32) -> (i32, i32) {
    %c0_i32 = arith.constant 0 : i32
    %c0_i32_0 = arith.constant 0 : i32
    return %c0_i32, %arg1 : i32, i32
  }
  func.func @transform_3(%arg0: i32, %arg1: i32) -> (i32, i32) {
    %c0_i32 = arith.constant 0 : i32
    return %arg0, %arg1 : i32, i32
  }
}

</mosaic_0001>

<bundles_post_ra>
// kernel: tpu_custom_call.1
= control target key start
LH: loop header
LB: loop body
LE: loop exit
PB: predicated region body
PF: predicated region fallthrough
CT: control target
= control target key end

     0   :  { %8 = vsyncpa [#allocation3], 0  ;;  %s877_s0 = inlined_call_operand.hbm [shape: f32[16,768], index: 0, kind: input, shape index: {}]   ;;  %s878_s1 = inlined_call_operand.hbm [shape: bf16[768,128], index: 1, kind: input, shape index: {}]   ;;  %s879_s2 = inlined_call_operand.vmem [shape: f32[1,128], index: 2, kind: input, shape index: {}]   ;;  %s880_s3 = inlined_call_operand.hbm [shape: f32[16,128], index: 3, kind: output, shape index: {}]  }
   0x1   :  { %9 = vsyncpa [#allocation6], 0 }
   0x2   :  { %10 = vsyncpa [#allocation4], 0  ;;  %s836_s12 = smov [#allocation2]  }
   0x3   :  { %s16_s13 = sshll.u32 %s836_s12, 4  ;;  %s17_s13 = int_to_ptr.vmem [resolvable:$true] %s16_s13 }
   0x4   :  { %s778_s14 = scalar_lea.vmem %s17_s13, 1536  ;;  %p783_p1 = scmp.lt.s32.totalorder %s17_s13, %s17_s13 }
   0x5   :  { %p779_p0 = scmp.ne.s32.totalorder %s17_s13, %s778_s14  ;;  %p784_p2 = scmp.lt.s32.totalorder %s778_s14, %s778_s14 }
   0x7   :  { %p785_p3 = por %p784_p2, %p783_p1 }
   0x9   :  { %p786_p4 = pnand %p785_p3, %p779_p0 }
   0xb   :  { %789 = shalt.err (!%p786_p4)
}
   0xc   :  { %s837_s15 = smov 768   ;;  %s838_s16 = smov 48  }
   0xd   :  { %22 = dma.hbm_to_vmem [thread:$0]  %s877_s0, 1536, %s17_s13, [#allocation3], %s837_s15, %s837_s15, %s838_s16  }
   0xe   :  { %s839_s19 = smov [#allocation5]  }
   0xf   :  { %s28_s20 = sshll.u32 %s839_s19, 4  ;;  %s29_s20 = int_to_ptr.vmem [resolvable:$true] %s28_s20 }
  0x10   :  { %s798_s21 = scalar_lea.vmem %s29_s20, 6144  ;;  %p803_p6 = scmp.lt.s32.totalorder %s29_s20, %s29_s20 }
  0x11   :  { %p799_p5 = scmp.ne.s32.totalorder %s29_s20, %s798_s21  ;;  %p804_p7 = scmp.lt.s32.totalorder %s798_s21, %s798_s21 }
  0x13   :  { %p805_p8 = por %p804_p7, %p803_p6 }
  0x15   :  { %p806_p9 = pnand %p805_p8, %p799_p5 }
  0x17   :  { %809 = shalt.err (!%p806_p9)
}
  0x18   :  { %s840_s22 = smov 64   ;;  %s841_s23 = smov 4  }
  0x19   :  { %34 = dma.hbm_to_vmem [thread:$0]  %s878_s1, 6144, %s29_s20, [#allocation6], %s840_s22, %s840_s22, %s841_s23  }
  0x1a   :  { %830 = dma.done.wait [#allocation3], 1536  }
  0x1b   :  { %831 = vsyncadd [#allocation3], 4294965760 }
  0x1c   :  { %832 = dma.done.wait [#allocation6], 6144  }
  0x1d   :  { %833 = vsyncadd [#allocation6], 4294961152  ;;  %v722_v0 = vld [vmem:[#allocation5 + $0x78] sm:$0xff]   ;;  %v726_v4 = vld [vmem:[#allocation5 + $0x70] sm:$0xff]   ;;  %s842_s26 = smov [#allocation7]  }
  0x1e   :  { %v723_v1 = vld [vmem:[#allocation5 + $0x38] sm:$0xff]   ;;  %647 = vmatprep.subr.bf16.mxu0 %v722_v0  ;;  %v727_v5 = vld [vmem:[#allocation5 + $0x30] sm:$0xff]   ;;  %v730_v8 = vld [vmem:[#allocation5 + $0x68] sm:$0xff]  }
  0x1f   :  { %v724_v2 = vld [vmem:[#allocation5 + $0xf8] sm:$0xff]   ;;  %648 = vmatpush3.bf16.msra.mxu0 %v723_v1  ;;  %v728_v6 = vld [vmem:[#allocation5 + $0xf0] sm:$0xff]   ;;  %v731_v9 = vld [vmem:[#allocation5 + $0x28] sm:$0xff]  }
  0x20   :  { %v725_v3 = vld [vmem:[#allocation5 + $0xb8] sm:$0xff]   ;;  %669 = vmatprep.subr.bf16.mxu1 %v724_v2  ;;  %649 = vmatprep.subr.bf16.mxu0 %v726_v4  ;;  %v729_v7 = vld [vmem:[#allocation5 + $0xb0] sm:$0xff]   ;;  %v732_v10 = vld [vmem:[#allocation5 + $0xe8] sm:$0xff]  }
  0x21   :  { %670 = vmatpush3.bf16.msra.mxu1 %v725_v3  ;;  %v733_v11 = vld [vmem:[#allocation5 + $0xa8] sm:$0xff]   ;;  %v734_v12 = vld [vmem:[#allocation5 + $0x60] sm:$0xff]   ;;  %v738_v16 = vld [vmem:[#allocation5 + $0x58] sm:$0xff]  }
  0x22   :  { %671 = vmatprep.subr.bf16.mxu1 %v728_v6  ;;  %v735_v13 = vld [vmem:[#allocation5 + $0x20] sm:$0xff]   ;;  %v739_v17 = vld [vmem:[#allocation5 + $0x18] sm:$0xff]   ;;  %v742_v20 = vld [vmem:[#allocation5 + $0x50] sm:$0xff]  }
  0x23   :  { %650 = vmatpush3.bf16.msra.mxu0 %v727_v5  ;;  %v736_v14 = vld [vmem:[#allocation5 + $0xe0] sm:$0xff]   ;;  %v740_v18 = vld [vmem:[#allocation5 + $0xd8] sm:$0xff]   ;;  %v743_v21 = vld [vmem:[#allocation5 + $0x10] sm:$0xff]  }
  0x24   :  { %651 = vmatprep.subr.bf16.mxu0 %v730_v8  ;;  %v737_v15 = vld [vmem:[#allocation5 + $0xa0] sm:$0xff]   ;;  %v741_v19 = vld [vmem:[#allocation5 + $0x98] sm:$0xff]   ;;  %v744_v22 = vld [vmem:[#allocation5 + $0xd0] sm:$0xff]  }
  0x25   :  { %672 = vmatpush3.bf16.msra.mxu1 %v729_v7  ;;  %v745_v23 = vld [vmem:[#allocation5 + $0x90] sm:$0xff]   ;;  %v746_v24 = vld [vmem:[#allocation5 + $0x48] sm:$0xff]   ;;  %v750_v28 = vld [vmem:[#allocation5 + $0x40] sm:$0xff]  }
  0x26   :  { %673 = vmatprep.subr.bf16.mxu1 %v732_v10  ;;  %v747_v25 = vld [vmem:[#allocation5 + $0x8] sm:$0xff]   ;;  %v751_v29 = vld [vmem:[#allocation5] sm:$0xff]   ;;  %v51_v32 = vld [vmem:[#allocation2 + $0x38] sm:$0xff] }
  0x27   :  { %652 = vmatpush3.bf16.msra.mxu0 %v731_v9  ;;  %v748_v26 = vld [vmem:[#allocation5 + $0xc8] sm:$0xff]   ;;  %v752_v30 = vld [vmem:[#allocation5 + $0xc0] sm:$0xff]   ;;  %v50_v36 = vld [vmem:[#allocation2 + $0x30] sm:$0xff] }
  0x28   :  { %653 = vmatprep.subr.bf16.mxu0 %v734_v12  ;;  %v749_v27 = vld [vmem:[#allocation5 + $0x88] sm:$0xff]   ;;  %v753_v34 = vld [vmem:[#allocation5 + $0x80] sm:$0xff]   ;;  %v754_v38 = vld [vmem:[#allocation5 + $0x178] sm:$0xff]  }
  0x29   :  { %674 = vmatpush3.bf16.msra.mxu1 %v733_v11  ;;  %v45_v31 = vld [vmem:[#allocation2 + $0x8] sm:$0xff]  ;;  %v44_v35 = vld [vmem:[#allocation2] sm:$0xff]  ;;  %v47_v39 = vld [vmem:[#allocation2 + $0x18] sm:$0xff] }
  0x2a   :  { %675 = vmatprep.subr.bf16.mxu1 %v736_v14  ;;  %v57_v33 = vpack.c.bf16 %v51_v32, %v45_v31  ;;  %v56_v37 = vpack.c.bf16 %v50_v36, %v44_v35  ;;  %v53_v40 = vld [vmem:[#allocation2 + $0x48] sm:$0xff]  ;;  %v755_v42 = vld [vmem:[#allocation5 + $0x138] sm:$0xff]   ;;  %v46_v43 = vld [vmem:[#allocation2 + $0x10] sm:$0xff] }
  0x2b   :  { %654 = vmatpush3.bf16.msra.mxu0 %v735_v13  ;;  %v59_v41 = vpack.c.bf16 %v53_v40, %v47_v39  ;;  %v52_v44 = vld [vmem:[#allocation2 + $0x40] sm:$0xff]  ;;  %v756_v46 = vld [vmem:[#allocation5 + $0x170] sm:$0xff]   ;;  %v758_v48 = vld [vmem:[#allocation5 + $0x168] sm:$0xff]  }
  0x2c   :  { %655 = vmatprep.subr.bf16.mxu0 %v738_v16  ;;  %485 = vmatprep.mubr.bf16.mxu0 %v57_v33  ;;  %v58_v45 = vpack.c.bf16 %v52_v44, %v46_v43  ;;  %v757_v47 = vld [vmem:[#allocation5 + $0x130] sm:$0xff]   ;;  %v759_v49 = vld [vmem:[#allocation5 + $0x128] sm:$0xff]   ;;  %v760_v50 = vld [vmem:[#allocation5 + $0x160] sm:$0xff]  }
  0x2d   :  { %676 = vmatpush3.bf16.msra.mxu1 %v737_v15  ;;  %526 = vmatprep.mubr.bf16.mxu1 %v59_v41  ;;  %v761_v51 = vld [vmem:[#allocation5 + $0x120] sm:$0xff]   ;;  %v762_v52 = vld [vmem:[#allocation5 + $0x158] sm:$0xff]   ;;  %v764_v54 = vld [vmem:[#allocation5 + $0x150] sm:$0xff]  }
  0x2e   :  { %677 = vmatprep.subr.bf16.mxu1 %v740_v18  ;;  %v763_v53 = vld [vmem:[#allocation5 + $0x118] sm:$0xff]   ;;  %v49_v55 = vld [vmem:[#allocation2 + $0x28] sm:$0xff]  ;;  %v765_v58 = vld [vmem:[#allocation5 + $0x110] sm:$0xff]  }
  0x2f   :  { %656 = vmatpush3.bf16.msra.mxu0 %v739_v17  ;;  %v55_v56 = vld [vmem:[#allocation2 + $0x58] sm:$0xff]  ;;  %v766_v59 = vld [vmem:[#allocation5 + $0x148] sm:$0xff]   ;;  %v768_v61 = vld [vmem:[#allocation5 + $0x140] sm:$0xff]  }
  0x30   :  { %657 = vmatprep.subr.bf16.mxu0 %v742_v20  ;;  %v61_v57 = vpack.c.bf16 %v55_v56, %v49_v55  ;;  %v767_v60 = vld [vmem:[#allocation5 + $0x108] sm:$0xff]   ;;  %v769_v62 = vld [vmem:[#allocation5 + $0x100] sm:$0xff]   ;;  %v54_v0 = vld [vmem:[#allocation2 + $0x50] sm:$0xff] }
  0x31   :  { %678 = vmatpush3.bf16.msra.mxu1 %v741_v19  ;;  %v48_v63 = vld [vmem:[#allocation2 + $0x20] sm:$0xff] }
  0x32   :  { %679 = vmatprep.subr.bf16.mxu1 %v744_v22  ;;  %v60_v1 = vpack.c.bf16 %v54_v0, %v48_v63  ;;  %v598_v8 = vld [vmem:[%s879_s2] ss:$0 sm:$0xff]  ;;  %s585_s2 = sshll.u32 %s842_s26, 4  ;;  %s586_s2 = int_to_ptr.vmem [resolvable:$true] %s585_s2 }
  0x33   :  { %658 = vmatpush3.bf16.msra.mxu0 %v743_v21  ;;  %s810_s27 = scalar_lea.vmem %s586_s2, 256  ;;  %p815_p11 = scmp.lt.s32.totalorder %s586_s2, %s586_s2 }
  0x34   :  { %659 = vmatprep.subr.bf16.mxu0 %v746_v24  ;;  %p811_p10 = scmp.ne.s32.totalorder %s586_s2, %s810_s27  ;;  %p816_p12 = scmp.lt.s32.totalorder %s810_s27, %s810_s27 }
  0x35   :  { %680 = vmatpush3.bf16.msra.mxu1 %v745_v23 }
  0x36   :  { %681 = vmatprep.subr.bf16.mxu1 %v748_v26  ;;  %p817_p13 = por %p816_p12, %p815_p11 }
  0x37   :  { %660 = vmatpush3.bf16.msra.mxu0 %v747_v25 }
  0x38   :  { %661 = vmatprep.subr.bf16.mxu0 %v750_v28  ;;  %p818_p0 = pnand %p817_p13, %p811_p10 }
  0x39   :  { %682 = vmatpush3.bf16.msra.mxu1 %v749_v27 }
  0x3a   :  { %683 = vmatprep.subr.bf16.mxu1 %v752_v30 }
  0x3b   :  { %662 = vmatpush3.bf16.msra.mxu0 %v751_v29 }
  0x3c   :  { %691 = vmatprep.subr.bf16.mxu0 %v754_v38 }
  0x3d   :  { %684 = vmatpush3.bf16.msra.mxu1 %v753_v34 }
  0x3e   :  { %486 = vmatmul.mubr.bf16.vlgmr.msra.gmra.mxu0 %v56_v37 }
  0x3f   :  { %692 = vmatpush3.bf16.msra.mxu0 %v755_v42  ;;  %567 = vmatprep.mubr.bf16.mxu0 %v61_v57 }
  0x40   :  { %527 = vmatmul.mubr.bf16.vlgmr.msra.gmra.mxu1 %v58_v45  ;;  %693 = vmatprep.subr.bf16.mxu0 %v756_v46 }
  0x43   :  { %694 = vmatpush3.bf16.msra.mxu0 %v757_v47 }
  0x44   :  { %695 = vmatprep.subr.bf16.mxu0 %v758_v48 }
  0x47   :  { %696 = vmatpush3.bf16.msra.mxu0 %v759_v49 }
  0x48   :  { %697 = vmatprep.subr.bf16.mxu0 %v760_v50 }
  0x4b   :  { %698 = vmatpush3.bf16.msra.mxu0 %v761_v51 }
  0x4c   :  { %699 = vmatprep.subr.bf16.mxu0 %v762_v52 }
  0x4f   :  { %700 = vmatpush3.bf16.msra.mxu0 %v763_v53 }
  0x50   :  { %701 = vmatprep.subr.bf16.mxu0 %v764_v54 }
  0x53   :  { %702 = vmatpush3.bf16.msra.mxu0 %v765_v58 }
  0x54   :  { %703 = vmatprep.subr.bf16.mxu0 %v766_v59 }
  0x57   :  { %704 = vmatpush3.bf16.msra.mxu0 %v767_v60 }
  0x58   :  { %705 = vmatprep.subr.bf16.mxu0 %v768_v61 }
  0x5b   :  { %706 = vmatpush3.bf16.msra.mxu0 %v769_v62 }
  0x5e   :  { %568 = vmatmul.mubr.bf16.vlgmr.msra.gmra.mxu0 %v60_v1 }
  0xfe   :  { %v663_v2 = vpop.f32.mrf.mxu0 }
 0x100   :  { %v664_v3 = vpop.f32.mrf.mxu0  ;;  %v685_v4 = vpop.f32.mrf.mxu1 }
 0x101   :  { %v665_v7 = vadd.f32 %v664_v3, %v663_v2 }
 0x102   :  { %v666_v5 = vpop.f32.mrf.mxu0  ;;  %v686_v6 = vpop.f32.mrf.mxu1 }
 0x103   :  { %v488_v11 = vadd.f32 %v665_v7, %v598_v8  ;;  %v687_v12 = vadd.f32 %v686_v6, %v685_v4 }
 0x104   :  { %v667_v9 = vpop.f32.mrf.mxu0  ;;  %v688_v10 = vpop.f32.mrf.mxu1 }
 0x105   :  { %v668_v13 = vadd.f32 %v667_v9, %v666_v5  ;;  %v529_v17 = vadd.f32 %v687_v12, %v488_v11 }
 0x106   :  { %v689_v14 = vpop.f32.mrf.mxu1 }
 0x107   :  { %v491_v18 = vadd.f32 %v668_v13, %v598_v8  ;;  %v690_v19 = vadd.f32 %v689_v14, %v688_v10 }
 0x109   :  { %v532_v24 = vadd.f32 %v690_v19, %v491_v18 }
 0x11e   :  { %v707_v15 = vpop.f32.mrf.mxu0 }
 0x120   :  { %v708_v16 = vpop.f32.mrf.mxu0 }
 0x121   :  { %v709_v20 = vadd.f32 %v708_v16, %v707_v15 }
 0x122   :  { %v710_v21 = vpop.f32.mrf.mxu0 }
 0x123   :  { %v570_v22 = vadd.f32 %v709_v20, %v529_v17 }
 0x124   :  { %v711_v23 = vpop.f32.mrf.mxu0 }
 0x125   :  { %v576_v25 = vmax.f32 %v570_v22, 0.0  ;;  %v712_v26 = vadd.f32 %v711_v23, %v710_v21 }
 0x127   :  { %578 = vst [vmem:[#allocation7] sm:$0xff] %v576_v25  ;;  %v573_v27 = vadd.f32 %v712_v26, %v532_v24 }
 0x129   :  { %v577_v28 = vmax.f32 %v573_v27, 0.0 }
 0x12b   :  { %579 = vst [vmem:[#allocation7 + $0x8] sm:$0xff] %v577_v28 }
 0x12c   :  { %821 = shalt.err (!%p818_p0)
}
 0x12d   :  { %s843_s28 = smov 128   ;;  %s844_s29 = smov 8  }
 0x12e   :  { %591 = dma.vmem_to_hbm [thread:$0]  %s586_s2, 256, %s880_s3, [#allocation4], %s843_s28, %s843_s28, %s844_s29  }
 0x12f   :  { %834 = dma.done.wait [#allocation4], 256  }
 0x130   :  { %835 = vsyncadd [#allocation4], 4294967040 }
 0x131   :  { %595 = vsyncpa [#allocation3], 1 }
 0x132   :  { %596 = vsyncpa [#allocation6], 1 }
 0x133   :  { %597 = vsyncpa [#allocation4], 1 }

</bundles_post_ra>
